<compile_context>
chip_gen: v5e
topology: v5e:2x2
jax: 0.10.0
libtpu: 0.0.40
codegen_flags: <defaults>
</compile_context>

<pallas_src>
import functools

import numpy as np
import jax
import jax.numpy as jnp
from jax.experimental import pallas as pl
from jax.experimental.pallas import tpu as pltpu

NUM_CLASSES = 14
BN_EPS = 1e-5
_VMEM_LIMIT = 32 * 1024 * 1024


def _round_up(x, m):
    return (x + m - 1) // m * m


def _mxu_tile_defaults():
    """(MAX_TM, MAX_TN, MAX_TK); v5e gets tn=128 for its 128x128 MXU."""
    kind = ""
    try:
        kind = jax.devices()[0].device_kind.lower()
    except Exception:
        pass
    if "v5 lite" in kind or "v5e" in kind or "v5lite" in kind:
        return 512, 128, 512
    return 512, 256, 1024


_MAX_TM, _MAX_TN, _MAX_TK = _mxu_tile_defaults()


def _pick_tile(dim, max_tile, align, prefer_split=False):
    """Pick (tile, padded_dim): prefer an aligned divisor (no padding), else a
    full-dim block (legal for any size), else pad up to max_tile multiples."""
    cap = max_tile
    if prefer_split and dim >= 2 * align:
        half = (dim // 2) // align * align
        cap = min(cap, max(half, align))
    best = 0
    t = align
    while t <= cap and t <= dim:
        if dim % t == 0:
            best = t
        t += align
    if best:
        return best, dim
    if dim <= max_tile:
        return dim, dim                      # full-extent block, no padding
    return max_tile, _round_up(dim, max_tile)


# ----------------------------------------------------------------------------
# Pallas kernels
# ----------------------------------------------------------------------------
def _mm_kernel(x_ref, w_ref, shift_ref, o_ref, acc_ref, *, relu):
    k = pl.program_id(2)

    @pl.when(k == 0)
    def _():
        acc_ref[...] = jnp.zeros_like(acc_ref)

    acc_ref[...] += jnp.dot(x_ref[...], w_ref[...],
                            preferred_element_type=jnp.float32)

    @pl.when(k == pl.num_programs(2) - 1)
    def _():
        y = acc_ref[...] + shift_ref[...]
        if relu:
            y = jnp.maximum(y, 0.0)
        o_ref[...] = y.astype(o_ref.dtype)


def _mm_res_kernel(x_ref, w_ref, shift_ref, r_ref, o_ref, acc_ref, *, relu):
    """Same as _mm_kernel but fuses a residual add before the activation."""
    k = pl.program_id(2)

    @pl.when(k == 0)
    def _():
        acc_ref[...] = jnp.zeros_like(acc_ref)

    acc_ref[...] += jnp.dot(x_ref[...], w_ref[...],
                            preferred_element_type=jnp.float32)

    @pl.when(k == pl.num_programs(2) - 1)
    def _():
        y = acc_ref[...] + shift_ref[...] + r_ref[...].astype(jnp.float32)
        if relu:
            y = jnp.maximum(y, 0.0)
        o_ref[...] = y.astype(o_ref.dtype)


def _max_tap_kernel(x_ref, o_ref):
    o_ref[...] = jnp.max(x_ref[...], axis=0)


# ----------------------------------------------------------------------------
# Matmul wrappers
# ----------------------------------------------------------------------------
def _weight_spec(tk, tn, deep_k):
    index_map = lambda i, j, k: (k, j)
    if deep_k:
        try:
            # deeper pipelining for deep-K matmuls (hides weight-tile DMA)
            return pl.BlockSpec((tk, tn), index_map, pipeline_mode=pl.Buffered(3))
        except Exception:
            pass
    return pl.BlockSpec((tk, tn), index_map)


def _mm_call(x, w, shift, residual, *, relu, out_dtype, tm, tn, tk):
    Mp, Kp = x.shape
    Np = w.shape[1]
    grid = (Mp // tm, Np // tn, Kp // tk)
    deep_k = grid[2] >= 4

    in_specs = [
        pl.BlockSpec((tm, tk), lambda i, j, k: (i, k)),
        _weight_spec(tk, tn, deep_k),
        pl.BlockSpec((1, tn), lambda i, j, k: (0, j)),
    ]
    args = [x, w, shift]
    if residual is not None:
        in_specs.append(pl.BlockSpec((tm, tn), lambda i, j, k: (i, j)))
        args.append(residual)
        kernel = functools.partial(_mm_res_kernel, relu=relu)
    else:
        kernel = functools.partial(_mm_kernel, relu=relu)

    return pl.pallas_call(
        kernel,
        out_shape=jax.ShapeDtypeStruct((Mp, Np), out_dtype),
        grid=grid,
        in_specs=in_specs,
        out_specs=pl.BlockSpec((tm, tn), lambda i, j, k: (i, j)),
        scratch_shapes=[pltpu.VMEM((tm, tn), jnp.float32)],
        compiler_params=pltpu.CompilerParams(
            dimension_semantics=("parallel", "parallel", "arbitrary"),
            vmem_limit_bytes=_VMEM_LIMIT),
    )(*args)


def matmul_shift(x, w, shift, *, relu=False, out_dtype=jnp.bfloat16):
    """y = act(x @ w + shift); generic path (GAP selector, bilinear matrices)."""
    M, K = x.shape
    N = w.shape[1]
    tm, Mp = _pick_tile(M, _MAX_TM, 8, prefer_split=True)
    tk, Kp = _pick_tile(K, _MAX_TK, 128)
    tn, Np = _pick_tile(N, _MAX_TN, 128)
    xb = x.astype(jnp.bfloat16)
    wb = w.astype(jnp.bfloat16)
    sb = shift.astype(jnp.float32)
    if (Mp, Kp) != (M, K):
        xb = jnp.pad(xb, ((0, Mp - M), (0, Kp - K)))
    if (Kp, Np) != (K, N):
        wb = jnp.pad(wb, ((0, Kp - K), (0, Np - N)))
    if Np != N:
        sb = jnp.pad(sb, (0, Np - N))
    out = _mm_call(xb, wb, sb.reshape(1, Np), None,
                   relu=relu, out_dtype=out_dtype, tm=tm, tn=tn, tk=tk)
    if (Mp, Np) != (M, N):
        out = out[:M, :N]
    return out


def _matmul_prepared(xm, residual, cp, *, relu, out_dtype):
    """Matmul against an init-time prepared (BN-folded, padded, bf16) weight."""
    M, K = xm.shape
    Kp, Np = cp["Kp"], cp["Np"]
    tk, tn = cp["tk"], cp["tn"]
    tm, Mp = _pick_tile(M, _MAX_TM, 8, prefer_split=True)
    xb = xm.astype(jnp.bfloat16)
    if (Mp, Kp) != (M, K):
        xb = jnp.pad(xb, ((0, Mp - M), (0, Kp - K)))
    rb = None
    if residual is not None:
        rb = residual.astype(jnp.bfloat16)
        if (Mp, Np) != (M, cp["cout"]):
            rb = jnp.pad(rb, ((0, Mp - M), (0, Np - cp["cout"])))
    out = _mm_call(xb, cp["w"], cp["shift"], rb,
                   relu=relu, out_dtype=out_dtype, tm=tm, tn=tn, tk=tk)
    if (Mp, Np) != (M, cp["cout"]):
        out = out[:M, :cp["cout"]]
    return out


# ----------------------------------------------------------------------------
# Conv / pool wrappers (im2col glue in plain JAX, compute in Pallas)
# ----------------------------------------------------------------------------
def _im2col(x, kh, kw, stride, padding, dilation, pad_value=0.0):
    n, h, w, c = x.shape
    xp = jnp.pad(x, ((0, 0), (padding, padding), (padding, padding), (0, 0)),
                 constant_values=pad_value)
    hp, wp = h + 2 * padding, w + 2 * padding
    ho = (hp - dilation * (kh - 1) - 1) // stride + 1
    wo = (wp - dilation * (kw - 1) - 1) // stride + 1
    cols = []
    for ki in range(kh):
        for kj in range(kw):
            cols.append(xp[:, ki * dilation: ki * dilation + (ho - 1) * stride + 1: stride,
                              kj * dilation: kj * dilation + (wo - 1) * stride + 1: stride, :])
    patches = jnp.stack(cols, axis=3)          # [N, Ho, Wo, kh*kw, C]
    return patches, ho, wo


def conv_apply(x, cp, *, relu=True, stride=1, padding=0, dilation=1,
               residual=None, out_dtype=jnp.bfloat16):
    kh, kw, cin, cout = cp["kh"], cp["kw"], cp["cin"], cp["cout"]
    n = x.shape[0]
    if kh == 1 and kw == 1 and padding == 0:
        # 1x1 conv: no im2col, optional strided spatial subsample.
        xs = x if stride == 1 else x[:, ::stride, ::stride, :]
        ho, wo = xs.shape[1], xs.shape[2]
        xm = xs.reshape(n * ho * wo, cin)
    else:
        patches, ho, wo = _im2col(x, kh, kw, stride, padding, dilation)
        xm = patches.reshape(n * ho * wo, kh * kw * cin)
    rm = None
    if residual is not None:
        rm = residual.reshape(n * ho * wo, cout)
    y = _matmul_prepared(xm, rm, cp, relu=relu, out_dtype=out_dtype)
    return y.reshape(n, ho, wo, cout)


def maxpool_3x3_s2(x):
    n, _, _, c = x.shape
    patches, ho, wo = _im2col(x, 3, 3, 2, 1, 1, pad_value=-jnp.inf)
    m = n * ho * wo
    xw = patches.transpose(3, 0, 1, 2, 4).reshape(9, m, c)
    tm, mp = _pick_tile(m, 1024, 8)
    if mp != m:
        xw = jnp.pad(xw, ((0, 0), (0, mp - m), (0, 0)))
    out = pl.pallas_call(
        _max_tap_kernel,
        out_shape=jax.ShapeDtypeStruct((mp, c), xw.dtype),
        grid=(mp // tm,),
        in_specs=[pl.BlockSpec((9, tm, c), lambda i: (0, i, 0))],
        out_specs=pl.BlockSpec((tm, c), lambda i: (i, 0)),
        compiler_params=pltpu.CompilerParams(
            dimension_semantics=("parallel",),
            vmem_limit_bytes=_VMEM_LIMIT),
    )(xw)
    if mp != m:
        out = out[:m]
    return out.reshape(n, ho, wo, c)


def global_avg_pool(x):
    # GAP as a tiny MXU matmul: (N, N*HW) block-diagonal averaging matrix.
    n, h, w, c = x.shape
    hw = h * w
    x2 = x.reshape(n * hw, c)
    sel = jnp.repeat(jnp.eye(n, dtype=jnp.float32), hw, axis=1) * (1.0 / hw)
    out = matmul_shift(sel, x2, jnp.zeros((c,), jnp.float32),
                       relu=False, out_dtype=x.dtype)
    return out.reshape(n, 1, 1, c)


def _bilinear_matrix(n_in, n_out):
    # align_corners=True (nn.UpsamplingBilinear2d)
    r = np.zeros((n_out, n_in), np.float32)
    if n_in == 1:
        r[:, 0] = 1.0
        return jnp.asarray(r)
    src = np.arange(n_out) * (n_in - 1) / (n_out - 1)
    lo = np.clip(np.floor(src).astype(np.int64), 0, n_in - 2)
    frac = (src - lo).astype(np.float32)
    r[np.arange(n_out), lo] += 1.0 - frac
    r[np.arange(n_out), lo + 1] += frac
    return jnp.asarray(r)


def upsample_bilinear_x8(x, out_dtype=jnp.float32):
    n, h, w, c = x.shape
    ho, wo = 8 * h, 8 * w
    rh = _bilinear_matrix(h, ho)
    rw = _bilinear_matrix(w, wo)
    xt = jnp.transpose(x, (1, 0, 2, 3)).reshape(h, n * w * c)
    y = matmul_shift(rh, xt, jnp.zeros((n * w * c,), jnp.float32),
                     relu=False, out_dtype=jnp.bfloat16)
    y = y.reshape(ho, n, w, c).transpose(1, 0, 2, 3)           # [N, Ho, W, C]
    yt = jnp.transpose(y, (2, 0, 1, 3)).reshape(w, n * ho * c)
    z = matmul_shift(rw, yt, jnp.zeros((n * ho * c,), jnp.float32),
                     relu=False, out_dtype=out_dtype)
    z = z.reshape(wo, n, ho, c).transpose(1, 2, 0, 3)          # [N, Ho, Wo, C]
    return z


# ----------------------------------------------------------------------------
# Deterministic parameter construction (BN folded, scaled into weights, padded
# to MXU tile multiples and cast to bf16 once at init).
# ----------------------------------------------------------------------------
class _ParamGen:
    def __init__(self, seed=0):
        self.key = jax.random.PRNGKey(seed)
        self.i = 0

    def next(self):
        self.i += 1
        return jax.random.fold_in(self.key, self.i)


def _prepare_conv(w4d, shift, kh, kw, cin, cout):
    K = kh * kw * cin
    tk, Kp = _pick_tile(K, _MAX_TK, 128)
    tn, Np = _pick_tile(cout, _MAX_TN, 128)
    w2 = w4d.reshape(K, cout)
    if (Kp, Np) != (K, cout):
        w2 = jnp.pad(w2, ((0, Kp - K), (0, Np - cout)))
    sh = shift.astype(jnp.float32)
    if Np != cout:
        sh = jnp.pad(sh, (0, Np - cout))
    return dict(w=w2.astype(jnp.bfloat16), shift=sh.reshape(1, Np),
                kh=kh, kw=kw, cin=cin, cout=cout,
                K=K, Kp=Kp, Np=Np, tk=tk, tn=tn)


def _make_conv_bn(pg, kh, kw, cin, cout):
    std = 0.5 * np.sqrt(2.0 / (kh * kw * cin))
    w = std * jax.random.normal(pg.next(), (kh, kw, cin, cout), jnp.float32)
    gamma = 1.0 + 0.1 * jax.random.normal(pg.next(), (cout,), jnp.float32)
    beta = 0.05 * jax.random.normal(pg.next(), (cout,), jnp.float32)
    mean = 0.05 * jax.random.normal(pg.next(), (cout,), jnp.float32)
    var = 0.5 + jax.random.uniform(pg.next(), (cout,), jnp.float32)
    scale = gamma / jnp.sqrt(var + BN_EPS)
    shift = beta - mean * scale
    return _prepare_conv(w * scale, shift, kh, kw, cin, cout)   # BN scale folded


# ResNet-50 layer config after smp make_dilated(output_stride=8):
# (planes, num_blocks, stride_of_first_block, dilation)
_LAYER_CFG = [(64, 3, 1, 1), (128, 4, 2, 1), (256, 6, 1, 2), (512, 3, 1, 4)]


def init_params(seed=0):
    pg = _ParamGen(seed)
    params = {"conv1": _make_conv_bn(pg, 7, 7, 6, 64)}   # 6-channel stem
    cin = 64
    layers = []
    for planes, n_blocks, stride, dilation in _LAYER_CFG:
        blocks = []
        for b in range(n_blocks):
            cout = planes * 4
            blk = {
                "conv1": _make_conv_bn(pg, 1, 1, cin, planes),
                "conv2": _make_conv_bn(pg, 3, 3, planes, planes),
                "conv3": _make_conv_bn(pg, 1, 1, planes, cout),
            }
            s = stride if b == 0 else 1
            if s != 1 or cin != cout:
                blk["down"] = _make_conv_bn(pg, 1, 1, cin, cout)
            blocks.append(blk)
            cin = cout
        layers.append(blocks)
    params["layers"] = layers

    params["aspp"] = {
        "b0": _make_conv_bn(pg, 1, 1, 2048, 256),
        "b1": _make_conv_bn(pg, 3, 3, 2048, 256),
        "b2": _make_conv_bn(pg, 3, 3, 2048, 256),
        "b3": _make_conv_bn(pg, 3, 3, 2048, 256),
        "pool": _make_conv_bn(pg, 1, 1, 2048, 256),
        "proj": _make_conv_bn(pg, 1, 1, 5 * 256, 256),
    }
    params["dec_conv"] = _make_conv_bn(pg, 3, 3, 256, 256)
    hw = 0.05 * jax.random.normal(pg.next(), (1, 1, 256, NUM_CLASSES), jnp.float32)
    hb = 0.01 * jax.random.normal(pg.next(), (NUM_CLASSES,), jnp.float32)
    params["head"] = _prepare_conv(hw, hb, 1, 1, 256, NUM_CLASSES)  # 1x1 conv + bias
    return params


# ----------------------------------------------------------------------------
# Forward pass
# ----------------------------------------------------------------------------
def _bottleneck(x, blk, stride, dilation):
    out = conv_apply(x, blk["conv1"], relu=True)
    out = conv_apply(out, blk["conv2"], relu=True,
                     stride=stride, padding=dilation, dilation=dilation)
    if "down" in blk:
        idn = conv_apply(x, blk["down"], relu=False, stride=stride)
    else:
        idn = x
    # conv3 + BN + residual add + ReLU, fused in one matmul epilogue.
    return conv_apply(out, blk["conv3"], relu=True, residual=idn)


def _encoder(x, params):
    x = conv_apply(x, params["conv1"], relu=True, stride=2, padding=3)
    x = maxpool_3x3_s2(x)
    for cfg, blocks in zip(_LAYER_CFG, params["layers"]):
        _, _, stride, dilation = cfg
        for b, blk in enumerate(blocks):
            s = stride if b == 0 else 1
            x = _bottleneck(x, blk, s, dilation)
    return x  # [N, H/8, W/8, 2048]


def _aspp(x, p):
    n, h, w, _ = x.shape
    r0 = conv_apply(x, p["b0"], relu=True)
    r1 = conv_apply(x, p["b1"], relu=True, padding=12, dilation=12)
    r2 = conv_apply(x, p["b2"], relu=True, padding=24, dilation=24)
    r3 = conv_apply(x, p["b3"], relu=True, padding=36, dilation=36)
    pooled = global_avg_pool(x)                         # [N,1,1,2048]
    pooled = conv_apply(pooled, p["pool"], relu=True)   # [N,1,1,256]
    r4 = jnp.broadcast_to(pooled, (n, h, w, 256)).astype(r0.dtype)
    cat = jnp.concatenate([r0, r1, r2, r3, r4], axis=-1)
    return conv_apply(cat, p["proj"], relu=True)        # Dropout(0.5): eval => identity


def custom_deeplabv3_forward(x_nchw, params):
    x = jnp.transpose(x_nchw, (0, 2, 3, 1)).astype(jnp.bfloat16)  # NCHW -> NHWC
    feats = _encoder(x, params)
    y = _aspp(feats, params["aspp"])
    y = conv_apply(y, params["dec_conv"], relu=True, padding=1)
    y = conv_apply(y, params["head"], relu=False)                 # 1x1 conv + bias
    y = upsample_bilinear_x8(y, out_dtype=jnp.float32)            # align_corners=True
    return jnp.transpose(y, (0, 3, 1, 2))                         # NHWC -> NCHW


if __name__ == "__main__":
    key = jax.random.PRNGKey(0)
    x = jax.random.normal(key, (2, 6, 16, 16), jnp.float32)   # NCHW, 6 channels
    params = init_params(seed=0)
    out = custom_deeplabv3_forward(x, params)
    out = jax.block_until_ready(out)
    assert out.shape == (2, NUM_CLASSES, 16, 16), out.shape
    assert bool(jnp.all(jnp.isfinite(out)))
    print("KERNEL_OK")
</pallas_src>

<mosaic_0001>
module attributes {stable_mosaic.version = 11 : i64} {
  func.func @_mm_kernel(%arg0: i32, %arg1: i32, %arg2: i32, %arg3: memref<64x294xbf16, #tpu.memory_space<vmem>>, %arg4: memref<294x64xbf16, #tpu.memory_space<vmem>>, %arg5: memref<1x64xf32, #tpu.memory_space<vmem>>, %arg6: memref<64x64xbf16, #tpu.memory_space<vmem>>, %arg7: memref<64x64xf32, #tpu.memory_space<vmem>>) attributes {dimension_semantics = [#tpu.dimension_semantics<parallel>, #tpu.dimension_semantics<parallel>, #tpu.dimension_semantics<arbitrary>], iteration_bounds = array<i64: 2, 1, 1>, scalar_prefetch = 0 : i64, scratch_operands = 1 : i64, tpu.core_type = #tpu.core_type<tc>, window_params = [{transform_indices = @transform_0, window_bounds = array<i64: 64, 294>}, {transform_indices = @transform_1, window_bounds = array<i64: 294, 64>}, {transform_indices = @transform_2, window_bounds = array<i64: 1, 64>}, {transform_indices = @transform_3, window_bounds = array<i64: 64, 64>}]} {
    %c0_i32 = arith.constant 0 : i32
    %0 = arith.cmpi eq, %arg2, %c0_i32 : i32
    %1 = arith.extui %0 : i1 to i32
    %c0_i32_0 = arith.constant 0 : i32
    %2 = arith.cmpi ne, %1, %c0_i32_0 : i32
    scf.if %2 {
      %cst_10 = arith.constant 0.000000e+00 : f32
      %12 = vector.broadcast %cst_10 : f32 to vector<64x64xf32>
      %c0_11 = arith.constant 0 : index
      %c0_12 = arith.constant 0 : index
      %13 = vector.load %arg7[%c0_11, %c0_12] : memref<64x64xf32, #tpu.memory_space<vmem>>, vector<64x64xf32>
      tpu.vector_store %arg7[%c0_11, %c0_12], %12 {strides = array<i32>} : memref<64x64xf32, #tpu.memory_space<vmem>>, vector<64x64xf32>,
    } else {
    }
    %c0 = arith.constant 0 : index
    %c0_1 = arith.constant 0 : index
    %3 = vector.load %arg7[%c0, %c0_1] : memref<64x64xf32, #tpu.memory_space<vmem>>, vector<64x64xf32>
    %c0_2 = arith.constant 0 : index
    %c0_3 = arith.constant 0 : index
    %4 = vector.load %arg3[%c0_2, %c0_3] : memref<64x294xbf16, #tpu.memory_space<vmem>>, vector<64x294xbf16>
    %c0_4 = arith.constant 0 : index
    %c0_5 = arith.constant 0 : index
    %5 = vector.load %arg4[%c0_4, %c0_5] : memref<294x64xbf16, #tpu.memory_space<vmem>>, vector<294x64xbf16>
    %cst = arith.constant dense<0.000000e+00> : vector<64x64xf32>
    %6 = tpu.matmul %4, %5, %cst {dimension_numbers = #tpu.dot_dimension_numbers<[1], [0], [0], [1], [0, 0, 1, 1], [], []>} : vector<64x294xbf16>, vector<294x64xbf16>, vector<64x64xf32> -> vector<64x64xf32>
    %7 = arith.addf %3, %6 : vector<64x64xf32>
    %c0_6 = arith.constant 0 : index
    %c0_7 = arith.constant 0 : index
    %8 = vector.load %arg7[%c0_6, %c0_7] : memref<64x64xf32, #tpu.memory_space<vmem>>, vector<64x64xf32>
    tpu.vector_store %arg7[%c0_6, %c0_7], %7 {strides = array<i32>} : memref<64x64xf32, #tpu.memory_space<vmem>>, vector<64x64xf32>,
    %c0_i32_8 = arith.constant 0 : i32
    %9 = arith.cmpi eq, %arg2, %c0_i32_8 : i32
    %10 = arith.extui %9 : i1 to i32
    %c0_i32_9 = arith.constant 0 : i32
    %11 = arith.cmpi ne, %10, %c0_i32_9 : i32
    scf.if %11 {
      %c0_10 = arith.constant 0 : index
      %c0_11 = arith.constant 0 : index
      %12 = vector.load %arg7[%c0_10, %c0_11] : memref<64x64xf32, #tpu.memory_space<vmem>>, vector<64x64xf32>
      %c0_12 = arith.constant 0 : index
      %c0_13 = arith.constant 0 : index
      %13 = vector.load %arg5[%c0_12, %c0_13] : memref<1x64xf32, #tpu.memory_space<vmem>>, vector<1x64xf32>
      %14 = vector.broadcast %13 : vector<1x64xf32> to vector<64x64xf32>
      %15 = arith.addf %12, %14 : vector<64x64xf32>
      %cst_14 = arith.constant 0.000000e+00 : f32
      %16 = vector.broadcast %cst_14 : f32 to vector<64x64xf32>
      %17 = arith.maximumf %15, %16 : vector<64x64xf32>
      %18 = arith.truncf %17 : vector<64x64xf32> to vector<64x64xbf16>
      %c0_15 = arith.constant 0 : index
      %c0_16 = arith.constant 0 : index
      %19 = vector.load %arg6[%c0_15, %c0_16] : memref<64x64xbf16, #tpu.memory_space<vmem>>, vector<64x64xbf16>
      tpu.vector_store %arg6[%c0_15, %c0_16], %18 {strides = array<i32>} : memref<64x64xbf16, #tpu.memory_space<vmem>>, vector<64x64xbf16>,
    } else {
    }
    return
  }
  func.func @transform_0(%arg0: i32, %arg1: i32, %arg2: i32) -> (i32, i32) {
    %c0_i32 = arith.constant 0 : i32
    return %arg0, %arg2 : i32, i32
  }
  func.func @transform_1(%arg0: i32, %arg1: i32, %arg2: i32) -> (i32, i32) {
    %c0_i32 = arith.constant 0 : i32
    return %arg2, %arg1 : i32, i32
  }
  func.func @transform_2(%arg0: i32, %arg1: i32, %arg2: i32) -> (i32, i32) {
    %c0_i32 = arith.constant 0 : i32
    %c0_i32_0 = arith.constant 0 : i32
    return %c0_i32, %arg1 : i32, i32
  }
  func.func @transform_3(%arg0: i32, %arg1: i32, %arg2: i32) -> (i32, i32) {
    %c0_i32 = arith.constant 0 : i32
    return %arg0, %arg1 : i32, i32
  }
}

</mosaic_0001>

<bundles_post_ra>
// kernel: tpu_custom_call.1
= control target key start
LH: loop header
LB: loop body
LE: loop exit
PB: predicated region body
PF: predicated region fallthrough
CT: control target
= control target key end

     0   :  { %s1051_s12 = smov 0   ;;  %s1053_s13 = smov 0   ;;  %s1233_s0 = inlined_call_operand.vmem [shape: bf16[128,294], index: 0, kind: input, shape index: {}]   ;;  %s1234_s1 = inlined_call_operand.vmem [shape: bf16[294,64], index: 1, kind: input, shape index: {}]   ;;  %s1235_s2 = inlined_call_operand.vmem [shape: f32[1,64], index: 2, kind: input, shape index: {}]   ;;  %s1236_s3 = inlined_call_operand.vmem [shape: bf16[128,64], index: 3, kind: output, shape index: {}]  }
   0x1   :  { %s1055_s14 = smov 0  }
   0x2 LB: > { %s32_s15 = sadd.s32 1, %s1024_s13  ;;  %p802_p0 = scmp.ge.s32.totalorder %s1028_s14, 1  ;;  %s1028_s14 = sphi %s1055_s14, %s13_s14   ;;  %s1024_s13 = sphi %s1053_s13, %s1238_s13   ;;  %s1020_s12 = sphi %s1051_s12, %s1237_s12  }
   0x3   : > { %p34_p1 = scmp.ge.s32.totalorder %s32_s15, 2  ;;  %p191_p2 = scmp.lt.s32.totalorder %s1028_s14, 3 }
   0x5   : > { %s1240_s15 = smov (%p34_p1, %s32_s15), 0  ;;  %p192_p3 = pnand %p802_p0, %p191_p2 }
   0x6   : > { %s803_s22 = sshll.u32 (!%p192_p3), %s1020_s12, 3 }
   0x7   : > { %195 = sbr.rel (%p192_p3) target bundleno = 239 (0xef), region = 32  ;;  %p236_p4 = scmp.lt.s32.totalorder (!%p192_p3), %s803_s22, 15 }
   0xc   : > { %v952_v0 = vld [vmem:[%s1234_s1 + $0x38] sm:$0xff]  ;;  %v341_v2 = vld [vmem:[%s1234_s1 + $0x90] sm:$0x7]  ;;  %vm526_vm0 = vcmask 1042432   ;;  %s1242_s22 = smov (!%p236_p4, %s803_s22), 15  ;;  %v962_v8 = vld [vmem:[%s1234_s1 + $0x88] sm:$0xff] }
   0xd   : > { %v1075_v1 = vld [vmem:[%s1234_s1 + $0x78] sm:$0xff]  ;;  %v475_v3 = vunpack.c.l.b16 %v341_v2  ;;  %530 = vmatpush.bf16.msra.mxu0 %v952_v0  ;;  %963 = vmatpush.bf16.msra.mxu3 %v952_v0  ;;  %v951_v4 = vld [vmem:[%s1234_s1 + $0x30] sm:$0xff]  ;;  %s979_s27 = smul.u32 12, %s1242_s22  ;;  %v950_v9 = vld [vmem:[%s1234_s1 + $0x28] sm:$0xff]  ;;  %vm513_vm1 = vcmask 310272   ;;  %vm272_vm2 = vcmask 523264  }
   0xe   : > { %971 = vmatpush.bf16.msra.mxu1 %v1075_v1  ;;  %v1087_v6 = vld [vmem:[%s1234_s1 + $0x70] sm:$0xff]  ;;  %v958_v10 = vld [vmem:[%s1234_s1 + $0x68] sm:$0xff]  ;;  %v961_v11 = vld [vmem:[%s1234_s1 + $0x80] sm:$0xff]  ;;  %v1030_v58 = vmov 0.0   ;;  %s806_s11 = sshll.u32 %s1242_s22, 2  ;;  %vm673_vm3 = vcmask 519168  }
   0xf   : > { %v494_v5 = vpack.c.b16 %v475_v3, %v475_v3  ;;  %s1105_s9 = scalar_lea.vmem %s1233_s0, %s979_s27  ;;  %v949_v12 = vld [vmem:[%s1234_s1 + $0x20] sm:$0xff]  ;;  %v948_v17 = vld [vmem:[%s1234_s1 + $0x18] sm:$0xff]  ;;  %v947_v19 = vld [vmem:[%s1234_s1 + $0x10] sm:$0xff]  ;;  %275 = vst.msk [vmem:[#allocation2 + $0x10] sm:$0xff] %vm272_vm2, %v1030_v58  ;;  %s1192_s17 = scalar_lea.vmem %s1236_s3, %s806_s11 }
  0x10   : > { %v817_v13 = vld [vmem:[%s1105_s9 + $0x8] sm:$0xf]  ;;  %v935_v14 = vld [vmem:[%s1105_s9 + $0x10] sm:$0xf0]  ;;  %v957_v15 = vld [vmem:[%s1234_s1 + $0x60] sm:$0xff]  ;;  %273 = vst.msk [vmem:[#allocation2] sm:$0xff] %vm272_vm2, %v1030_v58 }
  0x11   : > { %v528_v7 = vsel %vm526_vm0, %v494_v5, 0  ;;  %531 = vmatpush.bf16.msra.mxu0 %v951_v4  ;;  %964 = vmatpush.bf16.msra.mxu3 %v951_v4  ;;  %v818_v16 = vor.u32 %v935_v14, %v817_v13  ;;  %v956_v18 = vld [vmem:[%s1234_s1 + $0x58] sm:$0xff]  ;;  %v955_v20 = vld [vmem:[%s1234_s1 + $0x50] sm:$0xff]  ;;  %v946_v21 = vld [vmem:[%s1234_s1 + $0x8] sm:$0xff]  ;;  %274 = vst.msk [vmem:[#allocation2 + $0x8] sm:$0xff] %vm272_vm2, %v1030_v58 }
  0x12   : > { %593 = vmatpush.bf16.msra.mxu2 %v528_v7  ;;  %972 = vmatpush.bf16.msra.mxu1 %v1087_v6  ;;  %v954_v22 = vld [vmem:[%s1234_s1 + $0x48] sm:$0xff]  ;;  %v945_v23 = vld [vmem:[%s1234_s1] sm:$0xff]  ;;  %v821_v27 = vld [vmem:[%s1105_s9 + $0x18] sm:$0xf]  ;;  %276 = vst.msk [vmem:[#allocation2 + $0x18] sm:$0xff] %vm272_vm2, %v1030_v58 }
  0x13   : > { %v953_v24 = vld [vmem:[%s1234_s1 + $0x40] sm:$0xff]  ;;  %v938_v26 = vld [vmem:[%s1105_s9 + $0x28] sm:$0xf0]  ;;  %v936_v31 = vld [vmem:[%s1105_s9 + $0x1c] sm:$0xf]  ;;  %277 = vst.msk [vmem:[#allocation2 + $0x20] sm:$0xff] %vm272_vm2, %v1030_v58 }
  0x14   : > { %v829_v25 = vld [vmem:[%s1105_s9 + $0x20] sm:$0xf]  ;;  %v934_v29 = vld [vmem:[%s1105_s9 + $0x8] sm:$0xf0]  ;;  %v937_v30 = vld [vmem:[%s1105_s9 + $0x20] sm:$0xf0] }
  0x15   : > { %532 = vmatpush.bf16.msra.mxu0 %v950_v9  ;;  %965 = vmatpush.bf16.msra.mxu3 %v950_v9  ;;  %v809_v28 = vld [vmem:[%s1105_s9] sm:$0xf]  ;;  %v823_v32 = vld [vmem:[%s1105_s9 + $0x24] sm:$0xf0]  ;;  %v830_v33 = vor.u32 %v938_v26, %v829_v25  ;;  %v822_v35 = vor.u32 %v937_v30, %v821_v27  ;;  %v841_v37 = vld [vmem:[%s1105_s9 + $0x38] sm:$0xf] }
  0x16   : > { %594 = vmatpush.bf16.msra.mxu2 %v962_v8  ;;  %973 = vmatpush.bf16.msra.mxu1 %v958_v10  ;;  %v810_v34 = vor.u32 %v934_v29, %v809_v28  ;;  %v826_v36 = vor.u32 %v936_v31, %v823_v32  ;;  %v941_v38 = vld [vmem:[%s1105_s9 + $0x40] sm:$0xf0]  ;;  %v833_v39 = vld [vmem:[%s1105_s9 + $0x30] sm:$0xf]  ;;  %v940_v40 = vld [vmem:[%s1105_s9 + $0x38] sm:$0xf0] }
  0x17   : > { %v939_v41 = vld [vmem:[%s1105_s9 + $0x34] sm:$0xf]  ;;  %v835_v42 = vld [vmem:[%s1105_s9 + $0x3c] sm:$0xf0]  ;;  %v842_v43 = vor.u32 %v941_v38, %v841_v37  ;;  %v834_v44 = vor.u32 %v940_v40, %v833_v39  ;;  %v933_v46 = vld [vmem:[%s1105_s9 + $0x4] sm:$0xf] }
  0x18   : > { %v838_v45 = vor.u32 %v939_v41, %v835_v42  ;;  %v811_v47 = vld [vmem:[%s1105_s9 + $0xc] sm:$0xf0]  ;;  %v944_v49 = vld [vmem:[%s1105_s9 + $0x58] sm:$0xf0]  ;;  %v845_v50 = vld [vmem:[%s1105_s9 + $0x48] sm:$0xf] }
  0x19   : > { %533 = vmatpush.bf16.msra.mxu0 %v949_v12  ;;  %966 = vmatpush.bf16.msra.mxu3 %v949_v12  ;;  %v853_v48 = vld [vmem:[%s1105_s9 + $0x50] sm:$0xf]  ;;  %v814_v51 = vor.u32 %v933_v46, %v811_v47  ;;  %v943_v52 = vld [vmem:[%s1105_s9 + $0x50] sm:$0xf0]  ;;  %v942_v53 = vld [vmem:[%s1105_s9 + $0x4c] sm:$0xf] }
  0x1a   : > { %595 = vmatpush.bf16.msra.mxu2 %v961_v11  ;;  %974 = vmatpush.bf16.msra.mxu1 %v957_v15  ;;  %v847_v54 = vld [vmem:[%s1105_s9 + $0x54] sm:$0xf0]  ;;  %v854_v55 = vor.u32 %v944_v49, %v853_v48  ;;  %v846_v56 = vor.u32 %v943_v52, %v845_v50  ;;  %278 = vst.msk [vmem:[#allocation2 + $0x28] sm:$0xff] %vm272_vm2, %v1030_v58  ;;  %v1184_v11 = vld [vmem:[%s1235_s2] ss:$0 sm:$0xff]  ;;  %v282_v49 = vld [vmem:[#allocation2 + $0x8] sm:$0xff] }
  0x1b   : > { %v850_v57 = vor.u32 %v942_v53, %v847_v54  ;;  %279 = vst.msk [vmem:[#allocation2 + $0x30] sm:$0xff] %vm272_vm2, %v1030_v58  ;;  %v284_v9 = vld [vmem:[#allocation2 + $0x18] sm:$0xff] }
  0x1c   : > { %280 = vst.msk [vmem:[#allocation2 + $0x38] sm:$0xff] %vm272_vm2, %v1030_v58 }
  0x1d   : > { %927 = vmatmul.msk.bf16.vlgmr.msra.gmra.mxu2 %vm513_vm1, %v818_v16  ;;  %534 = vmatpush.bf16.msra.mxu0 %v948_v17 }
  0x1e   : > { %967 = vmatpush.bf16.msra.mxu3 %v948_v17  ;;  %975 = vmatpush.bf16.msra.mxu1 %v956_v18 }
  0x21   : > { %535 = vmatpush.bf16.msra.mxu0 %v947_v19 }
  0x22   : > { %968 = vmatpush.bf16.msra.mxu3 %v947_v19  ;;  %976 = vmatpush.bf16.msra.mxu1 %v955_v20  ;;  %v287_v52 = vld [vmem:[#allocation2 + $0x30] sm:$0xff] }
  0x25   : > { %536 = vmatpush.bf16.msra.mxu0 %v946_v21 }
  0x26   : > { %969 = vmatpush.bf16.msra.mxu3 %v946_v21  ;;  %977 = vmatpush.bf16.msra.mxu1 %v954_v22  ;;  %v285_v21 = vld [vmem:[#allocation2 + $0x20] sm:$0xff] }
  0x29   : > { %537 = vmatpush.bf16.msra.mxu0 %v945_v23 }
  0x2a   : > { %970 = vmatpush.bf16.msra.mxu3 %v945_v23  ;;  %978 = vmatpush.bf16.msra.mxu1 %v953_v24 }
  0x2c   : > { %538 = vmatmul.bf16.vlgmr.msra.gmra.mxu0 %v810_v34 }
  0x2d   : > { %559 = vmatpush.bf16.msrb.mxu0 %v1075_v1  ;;  %928 = vmatmul.msk.bf16.gmra.mxu2 %vm513_vm1, %v830_v33  ;;  %v283_v1 = vld [vmem:[#allocation2 + $0x10] sm:$0xff]  ;;  %v281_v33 = vld [vmem:[#allocation2] sm:$0xff] }
  0x2e   : > { %543 = vmatmul.bf16.vlgmr.msra.gmra.mxu3 %v822_v35  ;;  %572 = vmatmul.bf16.vlgmr.msra.gmra.mxu1 %v826_v36  ;;  %v286_v36 = vld [vmem:[#allocation2 + $0x28] sm:$0xff] }
  0x31   : > { %560 = vmatpush.bf16.msrb.mxu0 %v1087_v6 }
  0x35   : > { %561 = vmatpush.bf16.msrb.mxu0 %v958_v10 }
  0x39   : > { %562 = vmatpush.bf16.msrb.mxu0 %v957_v15 }
  0x3d   : > { %563 = vmatpush.bf16.msrb.mxu0 %v956_v18  ;;  %929 = vmatmul.msk.bf16.gmra.mxu2 %vm513_vm1, %v842_v43 }
  0x3e   : > { %548 = vmatmul.bf16.gmra.mxu3 %v834_v44  ;;  %577 = vmatmul.bf16.gmra.mxu1 %v838_v45 }
  0x41   : > { %564 = vmatpush.bf16.msrb.mxu0 %v955_v20 }
  0x45   : > { %565 = vmatpush.bf16.msrb.mxu0 %v954_v22 }
  0x49   : > { %566 = vmatpush.bf16.msrb.mxu0 %v953_v24 }
  0x4c   : > { %567 = vmatmul.bf16.vlgmr.msrb.gmra.mxu0 %v814_v51 }
  0x4d   : > { %930 = vmatmul.msk.bf16.gmra.mxu2 %vm513_vm1, %v854_v55 }
  0x4e   : > { %553 = vmatmul.bf16.gmra.mxu3 %v846_v56  ;;  %582 = vmatmul.bf16.gmra.mxu1 %v850_v57 }
  0xa0   : > { %v597_v59 = vpop.f32.mrf.mxu2 }
  0xa8   : > { %v1178_v60 = vpop.f32.mrf.mxu2 }
  0xa9   : > { %v539_v4 = vpop.f32.mrf.mxu0 }
  0xab   : > { %v573_v61 = vpop.f32.mrf.mxu1 }
  0xb0   : > { %v602_v62 = vpop.f32.mrf.mxu2 }
  0xb1   : > { %v544_v63 = vpop.f32.mrf.mxu3  ;;  %v541_v14 = vpop.f32.mrf.mxu0 }
  0xb2   : > { %v574_v0 = vadd.f32 %v573_v61, %v544_v63 }
  0xb3   : > { %v575_v2 = vpop.f32.mrf.mxu1 }
  0xb4   : > { %v603_v3 = vadd.f32 %v602_v62, %v574_v0 }
  0xb6   : > { %v619_v5 = vadd.f32 %v603_v3, %v283_v1 }
  0xb8   : > { %628 = vst.msk [vmem:[#allocation2 + $0x10] sm:$0xff] %vm272_vm2, %v619_v5  ;;  %v604_v6 = vpop.f32.mrf.mxu2 }
  0xb9   : > { %v546_v7 = vpop.f32.mrf.mxu3 }
  0xba   : > { %v576_v8 = vadd.f32 %v575_v2, %v546_v7 }
  0xbb   : > { %v578_v10 = vpop.f32.mrf.mxu1 }
  0xbc   : > { %v605_v12 = vadd.f32 %v604_v6, %v576_v8 }
  0xbe   : > { %v620_v13 = vadd.f32 %v605_v12, %v284_v9 }
  0xbf   : > { %v639_v15 = vld [vmem:[#allocation2 + $0x10] sm:$0xff] }
  0xc0   : > { %v651_v16 = vadd.f32 %v1184_v11, %v639_v15  ;;  %629 = vst.msk [vmem:[#allocation2 + $0x18] sm:$0xff] %vm272_vm2, %v620_v13  ;;  %v607_v17 = vpop.f32.mrf.mxu2 }
  0xc1   : > { %v549_v18 = vpop.f32.mrf.mxu3 }
  0xc2   : > { %v659_v19 = vmax.f32 %v651_v16, 0.0  ;;  %v579_v20 = vadd.f32 %v578_v10, %v549_v18 }
  0xc3   : > { %v580_v24 = vpop.f32.mrf.mxu1 }
  0xc4   : > { %v667_v22 = vpack.c.bf16 %v659_v19, %v659_v19  ;;  %v608_v23 = vadd.f32 %v607_v17, %v579_v20 }
  0xc6   : > { %676 = vst.msk [vmem:[%s1192_s17 + $0x8] sm:$0xf] %vm673_vm3, %v667_v22  ;;  %v621_v25 = vadd.f32 %v608_v23, %v285_v21 }
  0xc7   : > { %v640_v26 = vld [vmem:[#allocation2 + $0x18] sm:$0xff] }
  0xc8   : > { %v652_v27 = vadd.f32 %v1184_v11, %v640_v26  ;;  %630 = vst.msk [vmem:[#allocation2 + $0x20] sm:$0xff] %vm272_vm2, %v621_v25  ;;  %v609_v29 = vpop.f32.mrf.mxu2 }
  0xc9   : > { %v568_v28 = vpop.f32.mrf.mxu0  ;;  %v551_v31 = vpop.f32.mrf.mxu3 }
  0xca   : > { %v569_v30 = vadd.f32 %v568_v28, %v539_v4  ;;  %v660_v32 = vmax.f32 %v652_v27, 0.0  ;;  %v581_v34 = vadd.f32 %v580_v24, %v551_v31  ;;  %v288_v4 = vld [vmem:[#allocation2 + $0x38] sm:$0xff] }
  0xcb   : > { %v583_v42 = vpop.f32.mrf.mxu1 }
  0xcc   : > { %v598_v35 = vadd.f32 %v597_v59, %v569_v30  ;;  %v668_v37 = vpack.c.bf16 %v660_v32, %v660_v32  ;;  %v610_v38 = vadd.f32 %v609_v29, %v581_v34 }
  0xce   : > { %v617_v39 = vadd.f32 %v598_v35, %v281_v33  ;;  %677 = vst.msk [vmem:[%s1192_s17 + $0xc] sm:$0xf] %vm673_vm3, %v668_v37  ;;  %v622_v40 = vadd.f32 %v610_v38, %v286_v36 }
  0xcf   : > { %v641_v41 = vld [vmem:[#allocation2 + $0x20] sm:$0xff] }
  0xd0   : > { %626 = vst.msk [vmem:[#allocation2] sm:$0xff] %vm272_vm2, %v617_v39  ;;  %v653_v43 = vadd.f32 %v1184_v11, %v641_v41  ;;  %v612_v46 = vpop.f32.mrf.mxu2 }
  0xd1   : > { %631 = vst.msk [vmem:[#allocation2 + $0x28] sm:$0xff] %vm272_vm2, %v622_v40  ;;  %v570_v44 = vpop.f32.mrf.mxu0  ;;  %v554_v47 = vpop.f32.mrf.mxu3 }
  0xd2   : > { %v571_v45 = vadd.f32 %v570_v44, %v541_v14  ;;  %v661_v48 = vmax.f32 %v653_v43, 0.0  ;;  %v584_v50 = vadd.f32 %v583_v42, %v554_v47 }
  0xd3   : > { %v585_v62 = vpop.f32.mrf.mxu1 }
  0xd4   : > { %v600_v51 = vadd.f32 %v1178_v60, %v571_v45  ;;  %v669_v53 = vpack.c.bf16 %v661_v48, %v661_v48  ;;  %v613_v54 = vadd.f32 %v612_v46, %v584_v50 }
  0xd6   : > { %v618_v55 = vadd.f32 %v600_v51, %v282_v49  ;;  %678 = vst.msk [vmem:[%s1192_s17 + $0x10] sm:$0xf] %vm673_vm3, %v669_v53  ;;  %v623_v57 = vadd.f32 %v613_v54, %v287_v52 }
  0xd7   : > { %v637_v56 = vld [vmem:[#allocation2] sm:$0xff] }
  0xd8   : > { %v649_v58 = vadd.f32 %v1184_v11, %v637_v56  ;;  %v642_v59 = vld [vmem:[#allocation2 + $0x28] sm:$0xff]  ;;  %627 = vst.msk [vmem:[#allocation2 + $0x8] sm:$0xff] %vm272_vm2, %v618_v55  ;;  %v614_v3 = vpop.f32.mrf.mxu2 }
  0xd9   : > { %v654_v61 = vadd.f32 %v1184_v11, %v642_v59  ;;  %632 = vst.msk [vmem:[#allocation2 + $0x30] sm:$0xff] %vm272_vm2, %v623_v57  ;;  %v556_v63 = vpop.f32.mrf.mxu3 }
  0xda   : > { %v657_v60 = vmax.f32 %v649_v58, 0.0  ;;  %v586_v1 = vadd.f32 %v585_v62, %v556_v63 }
  0xdb   : > { %v662_v0 = vmax.f32 %v654_v61, 0.0 }
  0xdc   : > { %v665_v2 = vpack.c.bf16 %v657_v60, %v657_v60  ;;  %v615_v6 = vadd.f32 %v614_v3, %v586_v1 }
  0xdd   : > { %v670_v5 = vpack.c.bf16 %v662_v0, %v662_v0 }
  0xde   : > { %674 = vst.msk [vmem:[%s1192_s17] sm:$0xf] %vm673_vm3, %v665_v2  ;;  %v624_v8 = vadd.f32 %v615_v6, %v288_v4 }
  0xdf   : > { %679 = vst.msk [vmem:[%s1192_s17 + $0x14] sm:$0xf] %vm673_vm3, %v670_v5  ;;  %v638_v7 = vld [vmem:[#allocation2 + $0x8] sm:$0xff] }
  0xe0   : > { %v650_v9 = vadd.f32 %v1184_v11, %v638_v7  ;;  %v643_v10 = vld [vmem:[#allocation2 + $0x30] sm:$0xff]  ;;  %633 = vst.msk [vmem:[#allocation2 + $0x38] sm:$0xff] %vm272_vm2, %v624_v8 }
  0xe1   : > { %v655_v12 = vadd.f32 %v1184_v11, %v643_v10 }
  0xe2   : > { %v658_v13 = vmax.f32 %v650_v9, 0.0 }
  0xe3   : > { %v663_v14 = vmax.f32 %v655_v12, 0.0 }
  0xe4   : > { %v666_v15 = vpack.c.bf16 %v658_v13, %v658_v13 }
  0xe5   : > { %v671_v16 = vpack.c.bf16 %v663_v14, %v663_v14 }
  0xe6   : > { %675 = vst.msk [vmem:[%s1192_s17 + $0x4] sm:$0xf] %vm673_vm3, %v666_v15 }
  0xe7   : > { %680 = vst.msk [vmem:[%s1192_s17 + $0x18] sm:$0xf] %vm673_vm3, %v671_v16  ;;  %v644_v17 = vld [vmem:[#allocation2 + $0x38] sm:$0xff] }
  0xe8   : > { %v656_v18 = vadd.f32 %v1184_v11, %v644_v17 }
  0xea   : > { %v664_v19 = vmax.f32 %v656_v18, 0.0 }
  0xec   : > { %v672_v20 = vpack.c.bf16 %v664_v19, %v664_v19 }
  0xee   : > { %681 = vst.msk [vmem:[%s1192_s17 + $0x1c] sm:$0xf] %vm673_vm3, %v672_v20 }
  0xef PF: > { %s13_s14 = sadd.s32 1, %s1028_s14   ;;  %s1237_s12 = smov %s1024_s13 }
  0xf0   : > { %p10_p5 = scmp.ge.s32.totalorder %s13_s14, 4   ;;  %s1238_s13 = smov %s1240_s15 }
  0xf2   :  { %12 = sbr.rel (!%p10_p5) target bundleno = 2 (0x2), region = 76 }

</bundles_post_ra>
